<compile_context>
chip_gen: v7x
topology: tpu7x:2x2x1
jax: 0.10.0
libtpu: 0.0.40
codegen_flags: <defaults>
</compile_context>

<pallas_src>
import jax
import jax.numpy as jnp
from jax.experimental import pallas as pl
from jax.experimental.pallas import tpu as pltpu  # noqa: F401  (TPU backend)

# Small, module-consistent shapes.
B, S, D, DFF, H = 2, 16, 32, 64, 4
DK = D // H
HS = H * S          # 64
BS = B * S          # 32   (rows of the folded activations)
BHS = B * H * S     # 128  (score columns: full vreg lane width)
EPS = 1e-6


def _layer_norm(y, gamma, beta):
    mu = jnp.mean(y, axis=-1, keepdims=True)
    var = jnp.mean((y - mu) ** 2, axis=-1, keepdims=True)
    return gamma * (y - mu) * jax.lax.rsqrt(var + EPS) + beta


def encoder_layer_kernel(x_ref, bias_ref,
                         wqkv_ref, bqkv_ref, wo_ref, bo_ref,
                         w1_ref, b1_ref, w2_ref, b2_ref,
                         g1_ref, be1_ref, g2_ref, be2_ref,
                         rep_ref, vdm_ref, seg_ref,
                         o_ref):
    # Fold batch into the row (sublane) dim: layout-free collapse of leading dims.
    x2 = x_ref[...].reshape(BS, D)                                     # [32, 32]

    # Fused QKV projection (1/sqrt(DK) scale already folded into Wq/bq).
    qkv = jnp.dot(x2, wqkv_ref[...], preferred_element_type=jnp.float32) + bqkv_ref[...]
    q = qkv[:, :D]
    k = qkv[:, D:2 * D]
    v = qkv[:, 2 * D:]

    rep = rep_ref[...]        # [BHS, BS]  row-replication matrix (b,h,s ordering)
    vdm = vdm_ref[...]        # [BHS, D]   per-(batch,head) channel keep-mask

    # Block-diagonal (over batch x head) K and V, rows ordered (b, h, s):
    #   k_bd[c, d] = k[src_row(c), d] * (head(d) == head(c));  same for v_bd.
    # Built by a replication matmul + mask multiply: no concat/tile relayouts.
    k_bd = jnp.dot(rep, k, preferred_element_type=jnp.float32) * vdm   # [128, 32]
    v_bd = jnp.dot(rep, v, preferred_element_type=jnp.float32) * vdm   # [128, 32]

    # Scores for all (batch, head) blocks at once: [BS, BHS] = [32, 128].
    # bias masks padded keys and every cross-batch block with -1e9.
    s_all = jax.lax.dot_general(
        q, k_bd, (((1,), (1,)), ((), ())),
        preferred_element_type=jnp.float32) + bias_ref[...]

    # Per-(batch,head) softmax.  Shift by the global row max (shift-invariant);
    # per-(batch,head) denominators come from one segment-sum matmul.  Masked /
    # cross-batch columns have exp() == 0 exactly, so they neither pollute the
    # denominators nor contribute to the PV matmul.
    m = jnp.max(s_all, axis=-1, keepdims=True)
    e = jnp.exp(s_all - m)
    denom = jnp.dot(e, seg_ref[...], preferred_element_type=jnp.float32)
    # TODO(synk): a fully-masked query row would still give denom == 0 (NaN),
    # matching the -1e9 masking convention's limits; not handled.
    p = e / denom
    attn = jnp.dot(p, v_bd, preferred_element_type=jnp.float32)        # [32, 32] head-concat

    attn = jnp.dot(attn, wo_ref[...], preferred_element_type=jnp.float32) + bo_ref[...]

    # nn.Dropout is identity in eval mode; not applied.
    y = _layer_norm(x2 + attn, g1_ref[...], be1_ref[...])

    # Position-wise feed forward.
    h1 = jnp.dot(y, w1_ref[...], preferred_element_type=jnp.float32) + b1_ref[...]
    h1 = jnp.maximum(h1, jnp.float32(0.0))
    ff = jnp.dot(h1, w2_ref[...], preferred_element_type=jnp.float32) + b2_ref[...]

    out = _layer_norm(y + ff, g2_ref[...], be2_ref[...])
    o_ref[...] = out.reshape(B, S, D).astype(o_ref.dtype)              # layout-free split


def _attention_constants():
    """Structural constants for the (batch, head) block-diagonal attention."""
    cols = jnp.arange(BHS, dtype=jnp.int32)
    col_b = cols // HS                    # batch of each score column
    col_h = (cols % HS) // S              # head of each score column
    col_j = cols % S                      # key position of each score column
    src_row = col_b * S + col_j           # source row in the [B*S, D] K/V matrices

    rep = (src_row[:, None] ==
           jnp.arange(BS, dtype=jnp.int32)[None, :]).astype(jnp.float32)   # [BHS, BS]
    chan_h = jnp.arange(D, dtype=jnp.int32) // DK
    vdm = (col_h[:, None] == chan_h[None, :]).astype(jnp.float32)          # [BHS, D]
    seg = (col_h[:, None] == col_h[None, :]).astype(jnp.float32)           # [BHS, BHS]
    return rep, vdm, seg


def _mask_bias(mask):
    """Additive bias [B*S, B*H*S]: 0 where (same batch AND key kept by mask),
    -1e9 elsewhere (padded keys and every cross-batch block)."""
    cols = jnp.arange(BHS, dtype=jnp.int32)
    col_b = cols // HS
    col_j = cols % S
    rows = jnp.arange(BS, dtype=jnp.int32)
    row_b = rows // S
    row_i = rows % S
    keep = (row_b[:, None] == col_b[None, :]) & \
           (mask[row_b[:, None], row_i[:, None], col_j[None, :]] > 0)
    return jnp.where(keep, jnp.float32(0.0), jnp.float32(-1e9))


def encoder_layer(x, mask, params):
    (wq, bq, wk, bk, wv, bv, wo, bo, w1, b1, w2, b2, g1, be1, g2, be2) = params

    # Fuse Q/K/V and fold the attention scale into Wq/bq (free, host-side).
    scale = 1.0 / jnp.sqrt(jnp.float32(DK))
    wqkv = jnp.concatenate([wq * scale, wk, wv], axis=1)   # [D, 3D]
    bqkv = jnp.concatenate([bq * scale, bk, bv], axis=1)   # [1, 3D]

    rep, vdm, seg = _attention_constants()
    bias = _mask_bias(mask)

    # TODO(synk): at production shapes, cast MXU operands to bf16 on v6e/v7x
    # (keeping f32 accumulation, softmax and layernorm); skipped here so the
    # tiny, overhead-bound test case keeps a tight f32 tolerance.
    args = (x, bias, wqkv, bqkv, wo, bo, w1, b1, w2, b2,
            g1, be1, g2, be2, rep, vdm, seg)

    # Single fused step: no grid, every operand whole-array resident in VMEM
    # (default specs), one DMA each; nothing to pipeline or double-buffer.
    return pl.pallas_call(
        encoder_layer_kernel,
        out_shape=jax.ShapeDtypeStruct((B, S, D), jnp.float32),
    )(*args)


def reference(x, mask, params):
    (wq, bq, wk, bk, wv, bv, wo, bo, w1, b1, w2, b2, g1, be1, g2, be2) = params
    q = x @ wq + bq
    k = x @ wk + bk
    v = x @ wv + bv

    def split(t):  # [B,S,D] -> [B,H,S,DK]
        return t.reshape(B, S, H, DK).transpose(0, 2, 1, 3)

    qh, kh, vh = split(q), split(k), split(v)
    s = jnp.einsum("bhqd,bhkd->bhqk", qh, kh) / jnp.sqrt(jnp.float32(DK))
    s = jnp.where(mask[:, None, :, :] > 0, s, -1e9)
    p = jax.nn.softmax(s, axis=-1)
    attn = jnp.einsum("bhqk,bhkd->bhqd", p, vh).transpose(0, 2, 1, 3).reshape(B, S, D)
    attn = attn @ wo + bo
    y = _layer_norm(x + attn, g1, be1)
    ff = jnp.maximum(y @ w1 + b1, 0.0) @ w2 + b2
    return _layer_norm(y + ff, g2, be2)


def make_params(key):
    ks = jax.random.split(key, 12)
    g = lambda k, shape, sc: jax.random.normal(k, shape, jnp.float32) * sc
    wq, bq = g(ks[0], (D, D), 0.1), g(ks[1], (1, D), 0.02)
    wk, bk = g(ks[2], (D, D), 0.1), g(ks[3], (1, D), 0.02)
    wv, bv = g(ks[4], (D, D), 0.1), g(ks[5], (1, D), 0.02)
    wo, bo = g(ks[6], (D, D), 0.1), g(ks[7], (1, D), 0.02)
    w1, b1 = g(ks[8], (D, DFF), 0.1), g(ks[9], (1, DFF), 0.02)
    w2, b2 = g(ks[10], (DFF, D), 0.1), g(ks[11], (1, D), 0.02)
    g1, be1 = jnp.ones((1, D), jnp.float32), jnp.zeros((1, D), jnp.float32)
    g2, be2 = jnp.ones((1, D), jnp.float32), jnp.zeros((1, D), jnp.float32)
    return (wq, bq, wk, bk, wv, bv, wo, bo, w1, b1, w2, b2, g1, be1, g2, be2)


if __name__ == "__main__":
    key = jax.random.PRNGKey(0)
    kx, kp = jax.random.split(key)
    x = jax.random.normal(kx, (B, S, D), jnp.float32)

    # Key-padding-style mask: batch 0 sees all positions, batch 1 masks the last 4.
    valid = jnp.ones((B, S), jnp.float32).at[1, S - 4:].set(0.0)
    mask = jnp.broadcast_to(valid[:, None, :], (B, S, S)).astype(jnp.float32)

    params = make_params(kp)

    out = jax.block_until_ready(encoder_layer(x, mask, params))
    ref = reference(x, mask, params)

    assert out.shape == (B, S, D)
    err = float(jnp.max(jnp.abs(out - ref)))
    assert jnp.allclose(out, ref, atol=2e-3, rtol=2e-3), err
    print("KERNEL_OK")
</pallas_src>

<mosaic_0001>
module attributes {stable_mosaic.version = 11 : i64} {
  func.func @encoder_layer_kernel(%arg0: memref<2x16x32xf32, #tpu.memory_space<vmem>>, %arg1: memref<32x128xf32, #tpu.memory_space<vmem>>, %arg2: memref<32x96xf32, #tpu.memory_space<vmem>>, %arg3: memref<1x96xf32, #tpu.memory_space<vmem>>, %arg4: memref<32x32xf32, #tpu.memory_space<vmem>>, %arg5: memref<1x32xf32, #tpu.memory_space<vmem>>, %arg6: memref<32x64xf32, #tpu.memory_space<vmem>>, %arg7: memref<1x64xf32, #tpu.memory_space<vmem>>, %arg8: memref<64x32xf32, #tpu.memory_space<vmem>>, %arg9: memref<1x32xf32, #tpu.memory_space<vmem>>, %arg10: memref<1x32xf32, #tpu.memory_space<vmem>>, %arg11: memref<1x32xf32, #tpu.memory_space<vmem>>, %arg12: memref<1x32xf32, #tpu.memory_space<vmem>>, %arg13: memref<1x32xf32, #tpu.memory_space<vmem>>, %arg14: memref<128x32xf32, #tpu.memory_space<vmem>>, %arg15: memref<128x32xf32, #tpu.memory_space<vmem>>, %arg16: memref<128x128xf32, #tpu.memory_space<vmem>>, %arg17: memref<2x16x32xf32, #tpu.memory_space<vmem>>) attributes {dimension_semantics = [], scalar_prefetch = 0 : i64, scratch_operands = 0 : i64, tpu.core_type = #tpu.core_type<tc>} {
    %c0 = arith.constant 0 : index
    %c0_0 = arith.constant 0 : index
    %c0_1 = arith.constant 0 : index
    %0 = vector.load %arg0[%c0, %c0_0, %c0_1] : memref<2x16x32xf32, #tpu.memory_space<vmem>>, vector<2x16x32xf32>
    %1 = vector.shape_cast %0 : vector<2x16x32xf32> to vector<32x32xf32>
    %c0_2 = arith.constant 0 : index
    %c0_3 = arith.constant 0 : index
    %2 = vector.load %arg2[%c0_2, %c0_3] : memref<32x96xf32, #tpu.memory_space<vmem>>, vector<32x96xf32>
    %cst = arith.constant dense<0.000000e+00> : vector<32x96xf32>
    %3 = tpu.matmul %1, %2, %cst {dimension_numbers = #tpu.dot_dimension_numbers<[1], [0], [0], [1], [0, 0, 1, 1], [], []>} : vector<32x32xf32>, vector<32x96xf32>, vector<32x96xf32> -> vector<32x96xf32>
    %c0_4 = arith.constant 0 : index
    %c0_5 = arith.constant 0 : index
    %4 = vector.load %arg3[%c0_4, %c0_5] : memref<1x96xf32, #tpu.memory_space<vmem>>, vector<1x96xf32>
    %5 = vector.broadcast %4 : vector<1x96xf32> to vector<32x96xf32>
    %6 = arith.addf %3, %5 : vector<32x96xf32>
    %7 = vector.extract_strided_slice %6 {offsets = [0, 0], sizes = [32, 32], strides = [1, 1]} : vector<32x96xf32> to vector<32x32xf32>
    %8 = vector.extract_strided_slice %6 {offsets = [0, 32], sizes = [32, 32], strides = [1, 1]} : vector<32x96xf32> to vector<32x32xf32>
    %9 = vector.extract_strided_slice %6 {offsets = [0, 64], sizes = [32, 32], strides = [1, 1]} : vector<32x96xf32> to vector<32x32xf32>
    %c0_6 = arith.constant 0 : index
    %c0_7 = arith.constant 0 : index
    %10 = vector.load %arg14[%c0_6, %c0_7] : memref<128x32xf32, #tpu.memory_space<vmem>>, vector<128x32xf32>
    %c0_8 = arith.constant 0 : index
    %c0_9 = arith.constant 0 : index
    %11 = vector.load %arg15[%c0_8, %c0_9] : memref<128x32xf32, #tpu.memory_space<vmem>>, vector<128x32xf32>
    %cst_10 = arith.constant dense<0.000000e+00> : vector<128x32xf32>
    %12 = tpu.matmul %10, %8, %cst_10 {dimension_numbers = #tpu.dot_dimension_numbers<[1], [0], [0], [1], [0, 0, 1, 1], [], []>} : vector<128x32xf32>, vector<32x32xf32>, vector<128x32xf32> -> vector<128x32xf32>
    %13 = arith.mulf %12, %11 : vector<128x32xf32>
    %cst_11 = arith.constant dense<0.000000e+00> : vector<128x32xf32>
    %14 = tpu.matmul %10, %9, %cst_11 {dimension_numbers = #tpu.dot_dimension_numbers<[1], [0], [0], [1], [0, 0, 1, 1], [], []>} : vector<128x32xf32>, vector<32x32xf32>, vector<128x32xf32> -> vector<128x32xf32>
    %15 = arith.mulf %14, %11 : vector<128x32xf32>
    %cst_12 = arith.constant dense<0.000000e+00> : vector<32x128xf32>
    %16 = tpu.matmul %7, %13, %cst_12 {dimension_numbers = #tpu.dot_dimension_numbers<[1], [1], [0], [0], [0, 0, 1, 0], [], []>} : vector<32x32xf32>, vector<128x32xf32>, vector<32x128xf32> -> vector<32x128xf32>
    %c0_13 = arith.constant 0 : index
    %c0_14 = arith.constant 0 : index
    %17 = vector.load %arg1[%c0_13, %c0_14] : memref<32x128xf32, #tpu.memory_space<vmem>>, vector<32x128xf32>
    %18 = arith.addf %16, %17 : vector<32x128xf32>
    %cst_15 = arith.constant dense<0xFF800000> : vector<32xf32>
    %19 = vector.multi_reduction <maximumf>, %18, %cst_15 [1] : vector<32x128xf32> to vector<32xf32>
    %20 = vector.shape_cast %19 : vector<32xf32> to vector<32x1xf32>
    %21 = vector.broadcast %20 : vector<32x1xf32> to vector<32x128xf32>
    %22 = arith.subf %18, %21 : vector<32x128xf32>
    %23 = math.exp %22 : vector<32x128xf32>
    %c0_16 = arith.constant 0 : index
    %c0_17 = arith.constant 0 : index
    %24 = vector.load %arg16[%c0_16, %c0_17] : memref<128x128xf32, #tpu.memory_space<vmem>>, vector<128x128xf32>
    %cst_18 = arith.constant dense<0.000000e+00> : vector<32x128xf32>
    %25 = tpu.matmul %23, %24, %cst_18 {dimension_numbers = #tpu.dot_dimension_numbers<[1], [0], [0], [1], [0, 0, 1, 1], [], []>} : vector<32x128xf32>, vector<128x128xf32>, vector<32x128xf32> -> vector<32x128xf32>
    %26 = arith.divf %23, %25 : vector<32x128xf32>
    %cst_19 = arith.constant dense<0.000000e+00> : vector<32x32xf32>
    %27 = tpu.matmul %26, %15, %cst_19 {dimension_numbers = #tpu.dot_dimension_numbers<[1], [0], [0], [1], [0, 0, 1, 1], [], []>} : vector<32x128xf32>, vector<128x32xf32>, vector<32x32xf32> -> vector<32x32xf32>
    %c0_20 = arith.constant 0 : index
    %c0_21 = arith.constant 0 : index
    %28 = vector.load %arg4[%c0_20, %c0_21] : memref<32x32xf32, #tpu.memory_space<vmem>>, vector<32x32xf32>
    %cst_22 = arith.constant dense<0.000000e+00> : vector<32x32xf32>
    %29 = tpu.matmul %27, %28, %cst_22 {dimension_numbers = #tpu.dot_dimension_numbers<[1], [0], [0], [1], [0, 0, 1, 1], [], []>} : vector<32x32xf32>, vector<32x32xf32>, vector<32x32xf32> -> vector<32x32xf32>
    %c0_23 = arith.constant 0 : index
    %c0_24 = arith.constant 0 : index
    %30 = vector.load %arg5[%c0_23, %c0_24] : memref<1x32xf32, #tpu.memory_space<vmem>>, vector<1x32xf32>
    %31 = vector.broadcast %30 : vector<1x32xf32> to vector<32x32xf32>
    %32 = arith.addf %29, %31 : vector<32x32xf32>
    %33 = arith.addf %1, %32 : vector<32x32xf32>
    %c0_25 = arith.constant 0 : index
    %c0_26 = arith.constant 0 : index
    %34 = vector.load %arg10[%c0_25, %c0_26] : memref<1x32xf32, #tpu.memory_space<vmem>>, vector<1x32xf32>
    %c0_27 = arith.constant 0 : index
    %c0_28 = arith.constant 0 : index
    %35 = vector.load %arg11[%c0_27, %c0_28] : memref<1x32xf32, #tpu.memory_space<vmem>>, vector<1x32xf32>
    %cst_29 = arith.constant dense<0.000000e+00> : vector<32xf32>
    %36 = vector.multi_reduction <add>, %33, %cst_29 [1] : vector<32x32xf32> to vector<32xf32>
    %37 = vector.shape_cast %36 : vector<32xf32> to vector<32x1xf32>
    %cst_30 = arith.constant 3.200000e+01 : f32
    %38 = vector.broadcast %cst_30 : f32 to vector<32x1xf32>
    %39 = arith.divf %37, %38 : vector<32x1xf32>
    %40 = vector.broadcast %39 : vector<32x1xf32> to vector<32x32xf32>
    %41 = arith.subf %33, %40 : vector<32x32xf32>
    %42 = arith.mulf %41, %41 : vector<32x32xf32>
    %cst_31 = arith.constant dense<0.000000e+00> : vector<32xf32>
    %43 = vector.multi_reduction <add>, %42, %cst_31 [1] : vector<32x32xf32> to vector<32xf32>
    %44 = vector.shape_cast %43 : vector<32xf32> to vector<32x1xf32>
    %cst_32 = arith.constant 3.200000e+01 : f32
    %45 = vector.broadcast %cst_32 : f32 to vector<32x1xf32>
    %46 = arith.divf %44, %45 : vector<32x1xf32>
    %47 = vector.broadcast %39 : vector<32x1xf32> to vector<32x32xf32>
    %48 = arith.subf %33, %47 : vector<32x32xf32>
    %49 = vector.broadcast %34 : vector<1x32xf32> to vector<32x32xf32>
    %50 = arith.mulf %49, %48 : vector<32x32xf32>
    %cst_33 = arith.constant 9.99999997E-7 : f32
    %51 = vector.broadcast %cst_33 : f32 to vector<32x1xf32>
    %52 = arith.addf %46, %51 : vector<32x1xf32>
    %53 = math.rsqrt %52 : vector<32x1xf32>
    %54 = vector.broadcast %53 : vector<32x1xf32> to vector<32x32xf32>
    %55 = arith.mulf %50, %54 : vector<32x32xf32>
    %56 = vector.broadcast %35 : vector<1x32xf32> to vector<32x32xf32>
    %57 = arith.addf %55, %56 : vector<32x32xf32>
    %c0_34 = arith.constant 0 : index
    %c0_35 = arith.constant 0 : index
    %58 = vector.load %arg6[%c0_34, %c0_35] : memref<32x64xf32, #tpu.memory_space<vmem>>, vector<32x64xf32>
    %cst_36 = arith.constant dense<0.000000e+00> : vector<32x64xf32>
    %59 = tpu.matmul %57, %58, %cst_36 {dimension_numbers = #tpu.dot_dimension_numbers<[1], [0], [0], [1], [0, 0, 1, 1], [], []>} : vector<32x32xf32>, vector<32x64xf32>, vector<32x64xf32> -> vector<32x64xf32>
    %c0_37 = arith.constant 0 : index
    %c0_38 = arith.constant 0 : index
    %60 = vector.load %arg7[%c0_37, %c0_38] : memref<1x64xf32, #tpu.memory_space<vmem>>, vector<1x64xf32>
    %61 = vector.broadcast %60 : vector<1x64xf32> to vector<32x64xf32>
    %62 = arith.addf %59, %61 : vector<32x64xf32>
    %cst_39 = arith.constant 0.000000e+00 : f32
    %63 = vector.broadcast %cst_39 : f32 to vector<32x64xf32>
    %64 = arith.maximumf %62, %63 : vector<32x64xf32>
    %c0_40 = arith.constant 0 : index
    %c0_41 = arith.constant 0 : index
    %65 = vector.load %arg8[%c0_40, %c0_41] : memref<64x32xf32, #tpu.memory_space<vmem>>, vector<64x32xf32>
    %cst_42 = arith.constant dense<0.000000e+00> : vector<32x32xf32>
    %66 = tpu.matmul %64, %65, %cst_42 {dimension_numbers = #tpu.dot_dimension_numbers<[1], [0], [0], [1], [0, 0, 1, 1], [], []>} : vector<32x64xf32>, vector<64x32xf32>, vector<32x32xf32> -> vector<32x32xf32>
    %c0_43 = arith.constant 0 : index
    %c0_44 = arith.constant 0 : index
    %67 = vector.load %arg9[%c0_43, %c0_44] : memref<1x32xf32, #tpu.memory_space<vmem>>, vector<1x32xf32>
    %68 = vector.broadcast %67 : vector<1x32xf32> to vector<32x32xf32>
    %69 = arith.addf %66, %68 : vector<32x32xf32>
    %70 = arith.addf %57, %69 : vector<32x32xf32>
    %c0_45 = arith.constant 0 : index
    %c0_46 = arith.constant 0 : index
    %71 = vector.load %arg12[%c0_45, %c0_46] : memref<1x32xf32, #tpu.memory_space<vmem>>, vector<1x32xf32>
    %c0_47 = arith.constant 0 : index
    %c0_48 = arith.constant 0 : index
    %72 = vector.load %arg13[%c0_47, %c0_48] : memref<1x32xf32, #tpu.memory_space<vmem>>, vector<1x32xf32>
    %cst_49 = arith.constant dense<0.000000e+00> : vector<32xf32>
    %73 = vector.multi_reduction <add>, %70, %cst_49 [1] : vector<32x32xf32> to vector<32xf32>
    %74 = vector.shape_cast %73 : vector<32xf32> to vector<32x1xf32>
    %cst_50 = arith.constant 3.200000e+01 : f32
    %75 = vector.broadcast %cst_50 : f32 to vector<32x1xf32>
    %76 = arith.divf %74, %75 : vector<32x1xf32>
    %77 = vector.broadcast %76 : vector<32x1xf32> to vector<32x32xf32>
    %78 = arith.subf %70, %77 : vector<32x32xf32>
    %79 = arith.mulf %78, %78 : vector<32x32xf32>
    %cst_51 = arith.constant dense<0.000000e+00> : vector<32xf32>
    %80 = vector.multi_reduction <add>, %79, %cst_51 [1] : vector<32x32xf32> to vector<32xf32>
    %81 = vector.shape_cast %80 : vector<32xf32> to vector<32x1xf32>
    %cst_52 = arith.constant 3.200000e+01 : f32
    %82 = vector.broadcast %cst_52 : f32 to vector<32x1xf32>
    %83 = arith.divf %81, %82 : vector<32x1xf32>
    %84 = vector.broadcast %76 : vector<32x1xf32> to vector<32x32xf32>
    %85 = arith.subf %70, %84 : vector<32x32xf32>
    %86 = vector.broadcast %71 : vector<1x32xf32> to vector<32x32xf32>
    %87 = arith.mulf %86, %85 : vector<32x32xf32>
    %cst_53 = arith.constant 9.99999997E-7 : f32
    %88 = vector.broadcast %cst_53 : f32 to vector<32x1xf32>
    %89 = arith.addf %83, %88 : vector<32x1xf32>
    %90 = math.rsqrt %89 : vector<32x1xf32>
    %91 = vector.broadcast %90 : vector<32x1xf32> to vector<32x32xf32>
    %92 = arith.mulf %87, %91 : vector<32x32xf32>
    %93 = vector.broadcast %72 : vector<1x32xf32> to vector<32x32xf32>
    %94 = arith.addf %92, %93 : vector<32x32xf32>
    %95 = vector.shape_cast %94 : vector<32x32xf32> to vector<2x16x32xf32>
    %c0_54 = arith.constant 0 : index
    %c0_55 = arith.constant 0 : index
    %c0_56 = arith.constant 0 : index
    %96 = vector.load %arg17[%c0_54, %c0_55, %c0_56] : memref<2x16x32xf32, #tpu.memory_space<vmem>>, vector<2x16x32xf32>
    tpu.vector_store %arg17[%c0_54, %c0_55, %c0_56], %95 {strides = array<i32>} : memref<2x16x32xf32, #tpu.memory_space<vmem>>, vector<2x16x32xf32>,
    return
  }
}

</mosaic_0001>

<bundles_post_ra>
// kernel: tpu_custom_call.1
= control target key start
LH: loop header
LB: loop body
LE: loop exit
PB: predicated region body
PF: predicated region fallthrough
CT: control target
= control target key end

     0   :  { %s2754_s0 = inlined_call_operand.vmem [shape: f32[2,16,32], index: 0, kind: input, shape index: {}]   ;;  %s2755_s1 = inlined_call_operand.vmem [shape: f32[32,128], index: 1, kind: input, shape index: {}]   ;;  %s2756_s2 = inlined_call_operand.vmem [shape: f32[32,96], index: 2, kind: input, shape index: {}]   ;;  %s2757_s3 = inlined_call_operand.vmem [shape: f32[1,96], index: 3, kind: input, shape index: {}]   ;;  %s2758_s4 = inlined_call_operand.vmem [shape: f32[32,32], index: 4, kind: input, shape index: {}]   ;;  %s2759_s5 = inlined_call_operand.vmem [shape: f32[1,32], index: 5, kind: input, shape index: {}]   ;;  %s2760_s6 = inlined_call_operand.vmem [shape: f32[32,64], index: 6, kind: input, shape index: {}]   ;;  %s2761_s7 = inlined_call_operand.vmem [shape: f32[1,64], index: 7, kind: input, shape index: {}]   ;;  %s2762_s8 = inlined_call_operand.vmem [shape: f32[64,32], index: 8, kind: input, shape index: {}]   ;;  %s2763_s9 = inlined_call_operand.vmem [shape: f32[1,32], index: 9, kind: input, shape index: {}]   ;;  %s2764_s10 = inlined_call_operand.vmem [shape: f32[1,32], index: 10, kind: input, shape index: {}]   ;;  %s2765_s11 = inlined_call_operand.vmem [shape: f32[1,32], index: 11, kind: input, shape index: {}]   ;;  %s2766_s12 = inlined_call_operand.vmem [shape: f32[1,32], index: 12, kind: input, shape index: {}]   ;;  %s2767_s13 = inlined_call_operand.vmem [shape: f32[1,32], index: 13, kind: input, shape index: {}]   ;;  %s2768_s14 = inlined_call_operand.vmem [shape: f32[128,32], index: 14, kind: input, shape index: {}]   ;;  %s2769_s15 = inlined_call_operand.vmem [shape: f32[128,32], index: 15, kind: input, shape index: {}]   ;;  %s2770_s16 = inlined_call_operand.vmem [shape: f32[128,128], index: 16, kind: input, shape index: {}]   ;;  %s2771_s17 = inlined_call_operand.hbm [shape: f32[2,16,32], index: 17, kind: output, shape index: {}]  }
   0x1   :  { %2774 = sst [smem:[#allocation5_spill]] %s2754_s0 }
   0x2   :  { %2775 = sst [smem:[#allocation6_spill]] %s2755_s1 }
   0x3   :  { %v61_v0 = vld [vmem:[%s2756_s2] sm:$0xff]  ;;  %v62_v1 = vld [vmem:[%s2756_s2 + $0x8] sm:$0xff]  ;;  %v63_v2 = vld [vmem:[%s2756_s2 + $0x10] sm:$0xff]  ;;  %vm72_vm0 = vcmask 261120   ;;  %s2776_s1 = sld [smem:[#allocation5_spill]] }
   0x4   :  { %v1923_v3 = vpack.c.bf16 %v62_v1, %v61_v0  ;;  %v64_v4 = vld [vmem:[%s2756_s2 + $0x18] sm:$0xff] }
   0x5   :  { %v1927_v6 = vpack.c.bf16 %v64_v4, %v63_v2 }
   0x9   :  { %v2282_v5 = vld [vmem:[%s2776_s1] sm:$0xff] }
   0xa   :  { %1689 = vmatprep.mubr.msk.f32.mxu0 %vm72_vm0, %v2282_v5 }
   0xb   :  { %22 = vsyncpa [#allocation3], 0  ;;  %1924 = vmatprep.subr.bf16.mxu0 %v1923_v3  ;;  %v2289_v7 = vld [vmem:[%s2776_s1 + $0x8] sm:$0xff]  ;;  %v2294_v8 = vld [vmem:[%s2776_s1 + $0x10] sm:$0xff]  ;;  %s2173_s29 = smov 96   ;;  %s2779_s22 = sld [smem:[#allocation6_spill]] }
   0xc   :  { %1926 = vmatpush3.bf16.msra.mxu0 %v1923_v3  ;;  %v2303_v9 = vld [vmem:[%s2776_s1 + $0x18] sm:$0xff]  ;;  %v1469_v10 = vld [vmem:[%s2757_s3] ss:$0 sm:$0xff]  ;;  %s2172_s3 = smov 64   ;;  %v171_v38 = vld [vmem:[%s2768_s14 + $0x8] sm:$0xff]  ;;  %vm1273_vm2 = vcmask 523264  }
   0xd   :  { %1928 = vmatprep.subr.bf16.mxu0 %v1927_v6  ;;  %v170_v15 = vld [vmem:[%s2768_s14] sm:$0xff]  ;;  %v172_v39 = vld [vmem:[%s2768_s14 + $0x10] sm:$0xff]  ;;  %v173_v40 = vld [vmem:[%s2768_s14 + $0x18] sm:$0xff] }
   0xe   :  { %1703 = vmatprep.mubr.msk.f32.mxu1 %vm72_vm0, %v170_v15  ;;  %v174_v41 = vld [vmem:[%s2768_s14 + $0x20] sm:$0xff]  ;;  %v175_v42 = vld [vmem:[%s2768_s14 + $0x28] sm:$0xff]  ;;  %v176_v43 = vld [vmem:[%s2768_s14 + $0x30] sm:$0xff] }
   0xf   :  { %v177_v44 = vld [vmem:[%s2768_s14 + $0x38] sm:$0xff]  ;;  %v178_v45 = vld [vmem:[%s2768_s14 + $0x40] sm:$0xff]  ;;  %v179_v46 = vld [vmem:[%s2768_s14 + $0x48] sm:$0xff] }
  0x10   :  { %1930 = vmatpush3.bf16.msra.mxu0 %v1927_v6  ;;  %v180_v47 = vld [vmem:[%s2768_s14 + $0x50] sm:$0xff]  ;;  %v181_v48 = vld [vmem:[%s2768_s14 + $0x58] sm:$0xff]  ;;  %v182_v49 = vld [vmem:[%s2768_s14 + $0x60] sm:$0xff] }
  0x11   :  { %v183_v50 = vld [vmem:[%s2768_s14 + $0x68] sm:$0xff]  ;;  %v184_v51 = vld [vmem:[%s2768_s14 + $0x70] sm:$0xff]  ;;  %v185_v52 = vld [vmem:[%s2768_s14 + $0x78] sm:$0xff] }
  0x12   :  { %v2407_v53 = vld [vmem:[%s2769_s15 + $0x8] sm:$0xff]  ;;  %v2412_v54 = vld [vmem:[%s2769_s15] sm:$0xff]  ;;  %v2419_v59 = vld [vmem:[%s2769_s15 + $0x18] sm:$0xff] }
  0x13   :  { %1690 = vmatmul.mubr.msk.f32.vlgmr.msra.gmra.mrb[0].mxu0 %vm72_vm0, %v2289_v7  ;;  %vm2423_vm1 = vmpackc.low %vm72_vm0, %vm72_vm0  ;;  %v2430_v61 = vld [vmem:[%s2769_s15 + $0x10] sm:$0xff]  ;;  %v2439_v3 = vld [vmem:[%s2769_s15 + $0x28] sm:$0xff] }
  0x14   :  { %1692 = vmatprep.mubr.msk.f32.mxu0 %vm72_vm0, %v2294_v8  ;;  %v2446_v4 = vld [vmem:[%s2769_s15 + $0x20] sm:$0xff]  ;;  %v770_v60 = vld [vmem:[%s2770_s16 + $0x28] sm:$0xff] }
  0x17   :  { %1693 = vmatmul.mubr.msk.f32.gmra.mrb[2].mxu0 %vm72_vm0, %v2303_v9 }
  0x18   :  { %1735 = vmatprep.mubr.msk.f32.mxu0 %vm72_vm0, %v170_v15  ;;  %v2455_v15 = vld [vmem:[%s2769_s15 + $0x38] sm:$0xff] }
  0xe6   :  { %v1691_v11 = vpop.f32.mrb[0].mxu0 }
  0xe7   :  { %v2310_v12 = vadd.f32 %v1691_v11, %v1469_v10  ;;  %v151_v13 = vpop.f32.mrb[1].mxu0 }
  0xe8   :  { %v2312_v14 = vadd.f32 %v1469_v10, %v151_v13 }
  0xea   :  { %v1694_v16 = vpop.f32.mrb[2].mxu0  ;;  %v2106_v17 = vpack.i.bf16 %v2310_v12, %v2312_v14 }
  0xeb   :  { %v2321_v18 = vadd.f32 %v1694_v16, %v1469_v10  ;;  %v161_v19 = vpop.f32.mrb[3].mxu0  ;;  %v2460_v16 = vld [vmem:[%s2769_s15 + $0x30] sm:$0xff] }
  0xec   :  { %v2323_v20 = vadd.f32 %v1469_v10, %v161_v19  ;;  %2107 = vrot.lane.b32.xlu1 %v2106_v17, %s2172_s3  ;;  %2097 = vrot.lane.b32.xlu0 %v2106_v17, %s2173_s29 }
  0xee   :  { %v2111_v21 = vpack.i.bf16 %v2321_v18, %v2323_v20 }
  0xf0   :  { %2112 = vrot.lane.b32.xlu1 %v2111_v21, %s2172_s3  ;;  %2102 = vrot.lane.b32.xlu0 %v2111_v21, %s2173_s29 }
 0x15e   :  { %v2108_v22 = vpop.permute.xlu1 %2107  ;;  %v2098_v23 = vpop.permute.xlu0 %2097 }
 0x15f   :  { %v2110_v24 = vunpack.i.h.bf16 %v2108_v22  ;;  %v2109_v25 = vunpack.i.l.bf16 %v2108_v22  ;;  %v2100_v26 = vunpack.i.h.bf16 %v2098_v23  ;;  %v2099_v27 = vunpack.i.l.bf16 %v2098_v23 }
 0x161   :  { %v1939_v28 = vpack.c.bf16 %v2110_v24, %v2109_v25  ;;  %v1931_v29 = vpack.c.bf16 %v2100_v26, %v2099_v27  ;;  %v2467_v24 = vld [vmem:[%s2769_s15 + $0x48] sm:$0xff]  ;;  %v2474_v25 = vld [vmem:[%s2769_s15 + $0x40] sm:$0xff] }
 0x162   :  { %v2113_v30 = vpop.permute.xlu1 %2112  ;;  %v2103_v31 = vpop.permute.xlu0 %2102 }
 0x163   :  { %v2115_v32 = vunpack.i.h.bf16 %v2113_v30  ;;  %v2114_v33 = vunpack.i.l.bf16 %v2113_v30  ;;  %v2105_v34 = vunpack.i.h.bf16 %v2103_v31  ;;  %v2104_v35 = vunpack.i.l.bf16 %v2103_v31  ;;  %1932 = vmatprep.subr.bf16.mxu1 %v1931_v29  ;;  %1940 = vmatprep.subr.bf16.mxu0 %v1939_v28  ;;  %v2483_v31 = vld [vmem:[%s2769_s15 + $0x58] sm:$0xff] }
 0x164   :  { %1934 = vmatpush3.bf16.msra.mxu1 %v1931_v29  ;;  %1942 = vmatpush3.bf16.msra.mxu0 %v1939_v28 }
 0x165   :  { %v1943_v36 = vpack.c.bf16 %v2115_v32, %v2114_v33  ;;  %v1935_v37 = vpack.c.bf16 %v2105_v34, %v2104_v35  ;;  %v2488_v32 = vld [vmem:[%s2769_s15 + $0x50] sm:$0xff] }
 0x167   :  { %1936 = vmatprep.subr.bf16.mxu1 %v1935_v37  ;;  %1944 = vmatprep.subr.bf16.mxu0 %v1943_v36 }
 0x168   :  { %1938 = vmatpush3.bf16.msra.mxu1 %v1935_v37  ;;  %1946 = vmatpush3.bf16.msra.mxu0 %v1943_v36 }
 0x16b   :  { %1704 = vmatmul.mubr.msk.f32.vlgmr.msra.gmra.mrb[0].mxu1 %vm72_vm0, %v171_v38  ;;  %1736 = vmatmul.mubr.msk.f32.vlgmr.msra.gmra.mrb[4].mxu0 %vm72_vm0, %v171_v38  ;;  %v2495_v38 = vld [vmem:[%s2769_s15 + $0x68] sm:$0xff] }
 0x16c   :  { %1706 = vmatprep.mubr.msk.f32.mxu1 %vm72_vm0, %v172_v39  ;;  %1738 = vmatprep.mubr.msk.f32.mxu0 %vm72_vm0, %v172_v39  ;;  %v2502_v39 = vld [vmem:[%s2769_s15 + $0x60] sm:$0xff] }
 0x16f   :  { %1707 = vmatmul.mubr.msk.f32.gmra.mrb[2].mxu1 %vm72_vm0, %v173_v40  ;;  %1739 = vmatmul.mubr.msk.f32.gmra.mrb[6].mxu0 %vm72_vm0, %v173_v40 }
 0x170   :  { %1709 = vmatprep.mubr.msk.f32.mxu1 %vm72_vm0, %v174_v41  ;;  %1741 = vmatprep.mubr.msk.f32.mxu0 %vm72_vm0, %v174_v41 }
 0x173   :  { %1710 = vmatmul.mubr.msk.f32.gmra.mrb[4].mxu1 %vm72_vm0, %v175_v42  ;;  %1742 = vmatmul.mubr.msk.f32.gmra.mrb[8].mxu0 %vm72_vm0, %v175_v42 }
 0x174   :  { %1712 = vmatprep.mubr.msk.f32.mxu1 %vm72_vm0, %v176_v43  ;;  %1744 = vmatprep.mubr.msk.f32.mxu0 %vm72_vm0, %v176_v43 }
 0x177   :  { %1713 = vmatmul.mubr.msk.f32.gmra.mrb[6].mxu1 %vm72_vm0, %v177_v44  ;;  %1745 = vmatmul.mubr.msk.f32.gmra.mrb[10].mxu0 %vm72_vm0, %v177_v44 }
 0x178   :  { %1715 = vmatprep.mubr.msk.f32.mxu1 %vm72_vm0, %v178_v45  ;;  %1747 = vmatprep.mubr.msk.f32.mxu0 %vm72_vm0, %v178_v45  ;;  %v2511_v45 = vld [vmem:[%s2769_s15 + $0x78] sm:$0xff] }
 0x17b   :  { %1716 = vmatmul.mubr.msk.f32.gmra.mrb[8].mxu1 %vm72_vm0, %v179_v46  ;;  %1748 = vmatmul.mubr.msk.f32.gmra.mrb[12].mxu0 %vm72_vm0, %v179_v46  ;;  %v2516_v46 = vld [vmem:[%s2769_s15 + $0x70] sm:$0xff] }
 0x17c   :  { %1718 = vmatprep.mubr.msk.f32.mxu1 %vm72_vm0, %v180_v47  ;;  %1750 = vmatprep.mubr.msk.f32.mxu0 %vm72_vm0, %v180_v47 }
 0x17f   :  { %1719 = vmatmul.mubr.msk.f32.gmra.mrb[10].mxu1 %vm72_vm0, %v181_v48  ;;  %1751 = vmatmul.mubr.msk.f32.gmra.mrb[14].mxu0 %vm72_vm0, %v181_v48 }
 0x180   :  { %1721 = vmatprep.mubr.msk.f32.mxu1 %vm72_vm0, %v182_v49  ;;  %1753 = vmatprep.mubr.msk.f32.mxu0 %vm72_vm0, %v182_v49 }
 0x183   :  { %1722 = vmatmul.mubr.msk.f32.gmra.mrb[12].mxu1 %vm72_vm0, %v183_v50  ;;  %1754 = vmatmul.mubr.msk.f32.gmra.mrb[16].mxu0 %vm72_vm0, %v183_v50 }
 0x184   :  { %1724 = vmatprep.mubr.msk.f32.mxu1 %vm72_vm0, %v184_v51  ;;  %1756 = vmatprep.mubr.msk.f32.mxu0 %vm72_vm0, %v184_v51 }
 0x187   :  { %1725 = vmatmul.mubr.msk.f32.gmra.mrb[14].mxu1 %vm72_vm0, %v185_v52  ;;  %1757 = vmatmul.mubr.msk.f32.gmra.mrb[18].mxu0 %vm72_vm0, %v185_v52 }
 0x188   :  { %1791 = vmatprep.mubr.msk.f32.mxu1 %vm72_vm0, %v2312_v14 }
 0x23e   :  { %v1705_v55 = vpop.f32.mrb[0].mxu1 }
 0x23f   :  { %v412_v56 = vmul.f32 %v1705_v55, %v2407_v53  ;;  %v332_v57 = vpop.f32.mrb[1].mxu1  ;;  %v765_v55 = vld [vmem:[%s2770_s16] sm:$0xff] }
 0x240   :  { %v411_v58 = vmul.f32 %v332_v57, %v2412_v54  ;;  %v767_v57 = vld [vmem:[%s2770_s16 + $0x10] sm:$0xff] }
 0x242   :  { %v1947_v62 = vpack.c.bf16 %v412_v56, %v411_v58  ;;  %v1708_v63 = vpop.f32.mrb[2].mxu1  ;;  %v766_v56 = vld [vmem:[%s2770_s16 + $0x8] sm:$0xff] }
 0x243   :  { %v414_v0 = vmul.f32 %v1708_v63, %v2419_v59  ;;  %v342_v1 = vpop.f32.mrb[3].mxu1  ;;  %v1995_v58 = vpack.c.bf16 %v766_v56, %v765_v55  ;;  %v771_v63 = vld [vmem:[%s2770_s16 + $0x30] sm:$0xff] }
 0x244   :  { %1949 = vmatprep.subr.msk.bf16.mxu1 %vm2423_vm1, %v1947_v62  ;;  %v413_v2 = vmul.f32 %v342_v1, %v2430_v61 }
 0x245   :  { %1952 = vmatpush3.bf16.xpose.msk.msra.mxu1 %vm2423_vm1, %v1947_v62  ;;  %1996 = vmatprep.subr.bf16.mxu0 %v1995_v58 }
 0x246   :  { %v1953_v6 = vpack.c.bf16 %v414_v0, %v413_v2  ;;  %v1711_v10 = vpop.f32.mrb[4].mxu1  ;;  %1998 = vmatpush3.bf16.msra.mxu0 %v1995_v58  ;;  %v772_v0 = vld [vmem:[%s2770_s16 + $0x38] sm:$0xff]  ;;  %v601_v2 = vld [vmem:[%s2779_s22 + $0x8] sm:$0xff] }
 0x247   :  { %v416_v11 = vmul.f32 %v1711_v10, %v2439_v3  ;;  %v352_v13 = vpop.f32.mrb[5].mxu1  ;;  %v2007_v1 = vpack.c.bf16 %v772_v0, %v771_v63 }
 0x248   :  { %1955 = vmatprep.subr.msk.bf16.mxu1 %vm2423_vm1, %v1953_v6  ;;  %v415_v14 = vmul.f32 %v352_v13, %v2446_v4 }
 0x24a   :  { %v1959_v17 = vpack.c.bf16 %v416_v11, %v415_v14  ;;  %v1714_v19 = vpop.f32.mrb[6].mxu1 }
 0x24b   :  { %v418_v21 = vmul.f32 %v1714_v19, %v2455_v15  ;;  %v362_v22 = vpop.f32.mrb[7].mxu1 }
 0x24c   :  { %v417_v23 = vmul.f32 %v362_v22, %v2460_v16 }
 0x24d   :  { %1958 = vmatpush3.bf16.xpose.msk.msra.mxu1 %vm2423_vm1, %v1953_v6  ;;  %v600_v6 = vld [vmem:[%s2779_s22] sm:$0xff] }
 0x24e   :  { %1961 = vmatprep.subr.msk.bf16.mxu1 %vm2423_vm1, %v1959_v17  ;;  %v1965_v26 = vpack.c.bf16 %v418_v21, %v417_v23  ;;  %v1717_v27 = vpop.f32.mrb[8].mxu1  ;;  %v603_v23 = vld [vmem:[%s2779_s22 + $0x18] sm:$0xff] }
 0x24f   :  { %v420_v28 = vmul.f32 %v1717_v27, %v2467_v24  ;;  %v372_v29 = vpop.f32.mrb[9].mxu1  ;;  %v773_v27 = vld [vmem:[%s2770_s16 + $0x40] sm:$0xff] }
 0x250   :  { %v419_v30 = vmul.f32 %v372_v29, %v2474_v25 }
 0x252   :  { %v1971_v33 = vpack.c.bf16 %v420_v28, %v419_v30  ;;  %v1720_v34 = vpop.f32.mrb[10].mxu1  ;;  %v774_v28 = vld [vmem:[%s2770_s16 + $0x48] sm:$0xff]  ;;  %v775_v30 = vld [vmem:[%s2770_s16 + $0x50] sm:$0xff] }
 0x253   :  { %v422_v35 = vmul.f32 %v1720_v34, %v2483_v31  ;;  %v382_v36 = vpop.f32.mrb[11].mxu1  ;;  %v2011_v29 = vpack.c.bf16 %v774_v28, %v773_v27 }
 0x254   :  { %v421_v37 = vmul.f32 %v382_v36, %v2488_v32  ;;  %v778_v36 = vld [vmem:[%s2770_s16 + $0x68] sm:$0xff] }
 0x255   :  { %1964 = vmatpush3.bf16.xpose.msk.msra.mxu1 %vm2423_vm1, %v1959_v17  ;;  %v602_v17 = vld [vmem:[%s2779_s22 + $0x10] sm:$0xff] }
 0x256   :  { %1967 = vmatprep.subr.msk.bf16.mxu1 %vm2423_vm1, %v1965_v26  ;;  %v1977_v40 = vpack.c.bf16 %v422_v35, %v421_v37  ;;  %v1723_v41 = vpop.f32.mrb[12].mxu1  ;;  %v777_v35 = vld [vmem:[%s2770_s16 + $0x60] sm:$0xff] }
 0x257   :  { %v424_v42 = vmul.f32 %v1723_v41, %v2495_v38  ;;  %v392_v43 = vpop.f32.mrb[13].mxu1  ;;  %v2019_v37 = vpack.c.bf16 %v778_v36, %v777_v35  ;;  %v780_v41 = vld [vmem:[%s2770_s16 + $0x78] sm:$0xff] }
 0x258   :  { %v423_v44 = vmul.f32 %v392_v43, %v2502_v39  ;;  %v1737_v43 = vpop.f32.mrb[4].mxu0 }
 0x25a   :  { %v1983_v47 = vpack.c.bf16 %v424_v42, %v423_v44  ;;  %v1726_v48 = vpop.f32.mrb[14].mxu1  ;;  %v585_v44 = vmul.f32 %v1737_v43, %v2407_v53  ;;  %v962_v43 = vld [vmem:[%s2758_s4 + $0x18] sm:$0xff] }
 0x25b   :  { %v426_v49 = vmul.f32 %v1726_v48, %v2511_v45  ;;  %v402_v50 = vpop.f32.mrb[15].mxu1 }
 0x25c   :  { %v425_v51 = vmul.f32 %v402_v50, %v2516_v46 }
 0x25d   :  { %1970 = vmatpush3.bf16.xpose.msk.msra.mxu1 %vm2423_vm1, %v1965_v26 }
 0x25e   :  { %1973 = vmatprep.subr.msk.bf16.mxu1 %vm2423_vm1, %v1971_v33  ;;  %v1989_v52 = vpack.c.bf16 %v426_v49, %v425_v51 }
 0x265   :  { %1976 = vmatpush3.bf16.xpose.msk.msra.mxu1 %vm2423_vm1, %v1971_v33  ;;  %v776_v33 = vld [vmem:[%s2770_s16 + $0x58] sm:$0xff] }
 0x266   :  { %1979 = vmatprep.subr.msk.bf16.mxu1 %vm2423_vm1, %v1977_v40  ;;  %v2015_v34 = vpack.c.bf16 %v776_v33, %v775_v30 }
 0x26d   :  { %1982 = vmatpush3.bf16.xpose.msk.msra.mxu1 %vm2423_vm1, %v1977_v40  ;;  %v779_v40 = vld [vmem:[%s2770_s16 + $0x70] sm:$0xff] }
 0x26e   :  { %1985 = vmatprep.subr.msk.bf16.mxu1 %vm2423_vm1, %v1983_v47  ;;  %v2023_v42 = vpack.c.bf16 %v780_v41, %v779_v40  ;;  %v961_v41 = vld [vmem:[%s2758_s4 + $0x10] sm:$0xff] }
 0x275   :  { %1988 = vmatpush3.bf16.xpose.msk.msra.mxu1 %vm2423_vm1, %v1983_v47  ;;  %v505_v47 = vpop.f32.mrb[5].mxu0 }
 0x276   :  { %1991 = vmatprep.subr.msk.bf16.mxu1 %vm2423_vm1, %v1989_v52  ;;  %v584_v48 = vmul.f32 %v505_v47, %v2412_v54  ;;  %v1740_v49 = vpop.f32.mrb[6].mxu0 }
 0x277   :  { %v587_v50 = vmul.f32 %v1740_v49, %v2419_v59  ;;  %v515_v51 = vpop.f32.mrb[7].mxu0 }
 0x278   :  { %v586_v55 = vmul.f32 %v515_v51, %v2430_v61  ;;  %v1743_v56 = vpop.f32.mrb[8].mxu0 }
 0x279   :  { %v525_v58 = vpop.f32.mrb[9].mxu0 }
 0x27d   :  { %1994 = vmatpush3.bf16.xpose.msk.msra.mxu1 %vm2423_vm1, %v1989_v52  ;;  %v2027_v52 = vpack.c.bf16 %v585_v44, %v584_v48  ;;  %v2063_v44 = vpack.c.bf16 %v962_v43, %v961_v41  ;;  %v1259_v41 = vld [vmem:[%s2762_s8 + $0x8] sm:$0xff] }
 0x284   :  { %1792 = vmatmul.mubr.msk.f32.vlgmr.msra.gmra.mrb[16].mxu1 %vm72_vm0, %v2310_v12  ;;  %v768_v12 = vld [vmem:[%s2770_s16 + $0x18] sm:$0xff] }
 0x285   :  { %1794 = vmatprep.mubr.msk.f32.mxu1 %vm72_vm0, %v2323_v20  ;;  %v1999_v20 = vpack.c.bf16 %v768_v12, %v767_v57  ;;  %v589_v57 = vmul.f32 %v1743_v56, %v2439_v3  ;;  %v2031_v12 = vpack.c.bf16 %v587_v50, %v586_v55 }
 0x287   :  { %2000 = vmatprep.subr.bf16.mxu0 %v1999_v20 }
 0x288   :  { %1795 = vmatmul.mubr.msk.f32.gmra.mrb[18].mxu1 %vm72_vm0, %v2321_v18  ;;  %v769_v18 = vld [vmem:[%s2770_s16 + $0x20] sm:$0xff]  ;;  %2002 = vmatpush3.bf16.msra.mxu0 %v1999_v20  ;;  %v588_v20 = vmul.f32 %v525_v58, %v2446_v4 }
 0x289   :  { %v2003_v62 = vpack.c.bf16 %v770_v60, %v769_v18  ;;  %v1746_v18 = vpop.f32.mrb[10].mxu0 }
 0x28a   :  { %v591_v53 = vmul.f32 %v1746_v18, %v2455_v15  ;;  %v535_v60 = vpop.f32.mrb[11].mxu0  ;;  %v2035_v54 = vpack.c.bf16 %v589_v57, %v588_v20 }
 0x28b   :  { %2004 = vmatprep.subr.bf16.mxu0 %v2003_v62  ;;  %v1749_v59 = vpop.f32.mrb[12].mxu0 }
 0x28c   :  { %2006 = vmatpush3.bf16.msra.mxu0 %v2003_v62  ;;  %v590_v62 = vmul.f32 %v535_v60, %v2460_v16  ;;  %v593_v63 = vmul.f32 %v1749_v59, %v2467_v24  ;;  %v545_v0 = vpop.f32.mrb[13].mxu0 }
 0x28d   :  { %2008 = vmatprep.subr.bf16.mxu0 %v2007_v1  ;;  %v1752_v3 = vpop.f32.mrb[14].mxu0 }
 0x28e   :  { %v2039_v61 = vpack.c.bf16 %v591_v53, %v590_v62  ;;  %v1526_v62 = vld [vmem:[%s2759_s5] ss:$0 sm:$0xff] }
 0x290   :  { %2010 = vmatpush3.bf16.msra.mxu0 %v2007_v1  ;;  %v592_v1 = vmul.f32 %v545_v0, %v2474_v25 }
 0x291   :  { %2012 = vmatprep.subr.bf16.mxu0 %v2011_v29 }
 0x294   :  { %2014 = vmatpush3.bf16.msra.mxu0 %v2011_v29 }
 0x295   :  { %2016 = vmatprep.subr.bf16.mxu0 %v2015_v34 }
 0x298   :  { %2018 = vmatpush3.bf16.msra.mxu0 %v2015_v34 }
 0x299   :  { %2020 = vmatprep.subr.bf16.mxu0 %v2019_v37 }
 0x29c   :  { %2022 = vmatpush3.bf16.msra.mxu0 %v2019_v37 }
 0x29d   :  { %2024 = vmatprep.subr.bf16.mxu0 %v2023_v42 }
 0x2a0   :  { %2026 = vmatpush3.bf16.msra.mxu0 %v2023_v42 }
 0x2a1   :  { %2028 = vmatprep.subr.bf16.mxu0 %v2027_v52 }
 0x357   :  { %v1793_v10 = vpop.f32.mrb[16].mxu1 }
 0x358   :  { %v2574_v11 = vadd.f32 %v1793_v10, %v601_v2  ;;  %v726_v13 = vpop.f32.mrb[17].mxu1  ;;  %v595_v2 = vmul.f32 %v1752_v3, %v2483_v31  ;;  %v2043_v10 = vpack.c.bf16 %v593_v63, %v592_v1 }
 0x359   :  { %v2576_v14 = vadd.f32 %v726_v13, %v600_v6  ;;  %v555_v6 = vpop.f32.mrb[15].mxu0 }
 0x35a   :  { %747 = vmax.xlane.f32.xlu1 %v2574_v11  ;;  %v594_v4 = vmul.f32 %v555_v6, %v2488_v32  ;;  %v1755_v13 = vpop.f32.mrb[16].mxu0 }
 0x35b   :  { %v1796_v19 = vpop.f32.mrb[18].mxu1  ;;  %745 = vmax.xlane.f32.xlu0 %v2576_v14  ;;  %v597_v15 = vmul.f32 %v1755_v13, %v2495_v38 }
 0x35c   :  { %v736_v21 = vpop.f32.mrb[19].mxu1  ;;  %v2589_v26 = vadd.f32 %v1796_v19, %v603_v23  ;;  %v2047_v19 = vpack.c.bf16 %v595_v2, %v594_v4 }
 0x35d   :  { %v2583_v22 = vadd.f32 %v736_v21, %v602_v17  ;;  %v565_v17 = vpop.f32.mrb[17].mxu0 }
 0x35e   :  { %v596_v16 = vmul.f32 %v565_v17, %v2502_v39  ;;  %v1758_v21 = vpop.f32.mrb[18].mxu0 }
 0x35f   :  { %749 = vmax.xlane.f32.xlu0 %v2583_v22  ;;  %v599_v24 = vmul.f32 %v1758_v21, %v2511_v45  ;;  %v575_v23 = vpop.f32.mrb[19].mxu0 }
 0x360   :  { %v2051_v27 = vpack.c.bf16 %v597_v15, %v596_v16  ;;  %v598_v25 = vmul.f32 %v575_v23, %v2516_v46 }
 0x362   :  { %v2055_v28 = vpack.c.bf16 %v599_v24, %v598_v25 }
 0x363   :  { %751 = vmax.xlane.f32.xlu0 %v2589_v26 }
 0x3e7   :  { %v748_v31 = vpop.xlane.xlu1 %747 }
 0x3e8   :  { %v754_v29 = vsub.f32 %v2574_v11, %v748_v31  ;;  %v746_v30 = vpop.xlane.xlu0 %745 }
 0x3e9   :  { %v753_v32 = vsub.f32 %v2576_v14, %v746_v30 }
 0x3ea   :  { %v759_v33 = vmul.f32 1.442695, %v754_v29 }
 0x3eb   :  { %v757_v38 = vmul.f32 1.442695, %v753_v32 }
 0x3ec   :  { %v750_v34 = vpop.xlane.xlu0 %749 }
 0x3ed   :  { %2116 = vpow2.f32 %v757_v38  ;;  %v755_v39 = vsub.f32 %v2583_v22, %v750_v34  ;;  %v959_v22 = vld [vmem:[%s2758_s4] sm:$0xff] }
 0x3ee   :  { %2118 = vpow2.f32 %v759_v33 }
 0x3ef   :  { %v761_v35 = vmul.f32 1.442695, %v755_v39 }
 0x3f0   :  { %v752_v45 = vpop.xlane.xlu0 %751 }
 0x3f1   :  { %2120 = vpow2.f32 %v761_v35  ;;  %v756_v36 = vsub.f32 %v2589_v26, %v752_v45  ;;  %v960_v26 = vld [vmem:[%s2758_s4 + $0x8] sm:$0xff] }
 0x3f2   :  { %v2059_v42 = vpack.c.bf16 %v960_v26, %v959_v22  ;;  %v1258_v26 = vld [vmem:[%s2762_s8] sm:$0xff] }
 0x3f3   :  { %v763_v46 = vmul.f32 1.442695, %v756_v36  ;;  %v2075_v43 = vpack.c.bf16 %v1259_v41, %v1258_v26 }
 0x3f4   :  { %2060 = vmatprep.subr.bf16.mxu1 %v2059_v42 }
 0x3f5   :  { %2122 = vpow2.f32 %v763_v46  ;;  %2062 = vmatpush3.bf16.msra.mxu1 %v2059_v42  ;;  %v1146_v46 = vld [vmem:[%s2760_s6] sm:$0xff]  ;;  %v1260_v42 = vld [vmem:[%s2762_s8 + $0x10] sm:$0xff] }
 0x3f6   :  { %2064 = vmatprep.subr.bf16.mxu1 %v2063_v44 }
 0x3f7   :  { %v2117_v37 = vpop.eup %2116 }
 0x3f8   :  { %v2119_v40 = vpop.eup %2118  ;;  %1829 = vmatprep.mubr.f32.mxu0 %v2117_v37 }
 0x3f9   :  { %1830 = vmatmul.mubr.f32.vlgmr.msra.gmra.mrb[20].mxu0 %v2119_v40  ;;  %2066 = vmatpush3.bf16.msra.mxu1 %v2063_v44  ;;  %v1261_v44 = vld [vmem:[%s2762_s8 + $0x18] sm:$0xff] }
 0x3fa   :  { %2030 = vmatpush3.bf16.msra.mxu0 %v2027_v52  ;;  %2076 = vmatprep.subr.bf16.mxu1 %v2075_v43 }
 0x3fb   :  { %v2121_v11 = vpop.eup %2120  ;;  %2032 = vmatprep.subr.bf16.mxu0 %v2031_v12 }
 0x3fc   :  { %1832 = vmatprep.mubr.f32.mxu0 %v2121_v11 }
 0x3fe   :  { %2034 = vmatpush3.bf16.msra.mxu0 %v2031_v12 }
 0x3ff   :  { %v2123_v14 = vpop.eup %2122  ;;  %2036 = vmatprep.subr.bf16.mxu0 %v2035_v54 }
 0x400   :  { %1833 = vmatmul.mubr.f32.gmra.mrb[22].mxu0 %v2123_v14 }
 0x402   :  { %2038 = vmatpush3.bf16.msra.mxu0 %v2035_v54 }
 0x403   :  { %2040 = vmatprep.subr.bf16.mxu0 %v2039_v61 }
 0x406   :  { %2042 = vmatpush3.bf16.msra.mxu0 %v2039_v61 }
 0x407   :  { %2044 = vmatprep.subr.bf16.mxu0 %v2043_v10 }
 0x40a   :  { %2046 = vmatpush3.bf16.msra.mxu0 %v2043_v10 }
 0x40b   :  { %2048 = vmatprep.subr.bf16.mxu0 %v2047_v19 }
 0x40e   :  { %2050 = vmatpush3.bf16.msra.mxu0 %v2047_v19 }
 0x40f   :  { %2052 = vmatprep.subr.bf16.mxu0 %v2051_v27 }
 0x412   :  { %2054 = vmatpush3.bf16.msra.mxu0 %v2051_v27 }
 0x413   :  { %2056 = vmatprep.subr.bf16.mxu0 %v2055_v28 }
 0x416   :  { %2058 = vmatpush3.bf16.msra.mxu0 %v2055_v28 }
 0x4cc   :  { %v1831_v47 = vpop.f32.mrb[20].mxu0 }
 0x4cd   :  { %2124 = vrcp.f32 %v1831_v47  ;;  %v847_v48 = vpop.f32.mrb[21].mxu0  ;;  %v2079_v47 = vpack.c.bf16 %v1261_v44, %v1260_v42 }
 0x4ce   :  { %2126 = vrcp.f32 %v847_v48  ;;  %v1262_v48 = vld [vmem:[%s2762_s8 + $0x20] sm:$0xff] }
 0x4d3   :  { %v1834_v49 = vpop.f32.mrb[22].mxu0 }
 0x4d4   :  { %2128 = vrcp.f32 %v1834_v49  ;;  %v857_v50 = vpop.f32.mrb[23].mxu0  ;;  %v1263_v49 = vld [vmem:[%s2762_s8 + $0x28] sm:$0xff] }
 0x4d5   :  { %2130 = vrcp.f32 %v857_v50  ;;  %v2083_v50 = vpack.c.bf16 %v1263_v49, %v1262_v48 }
 0x4d7   :  { %v2125_v51 = vpop.eup %2124 }
 0x4d8   :  { %v2127_v52 = vpop.eup %2126  ;;  %v869_v56 = vmul.f32 %v2125_v51, %v2119_v40 }
 0x4d9   :  { %v867_v55 = vmul.f32 %v2127_v52, %v2117_v37  ;;  %v1147_v37 = vld [vmem:[%s2760_s6 + $0x8] sm:$0xff] }
 0x4da   :  { %v2067_v40 = vpack.c.bf16 %v1147_v37, %v1146_v46 }
 0x4db   :  { %1867 = vmatprep.mubr.f32.mxu0 %v867_v55 }
 0x4dc   :  { %1868 = vmatmul.mubr.f32.vlgmr.msra.gmra.mrb[24].mxu0 %v869_v56  ;;  %2068 = vmatprep.subr.bf16.mxu0 %v2067_v40 }
 0x4dd   :  { %2070 = vmatpush3.bf16.msra.mxu0 %v2067_v40 }
 0x4de   :  { %v2129_v57 = vpop.eup %2128 }
 0x4df   :  { %v2131_v58 = vpop.eup %2130  ;;  %v873_v20 = vmul.f32 %v2129_v57, %v2123_v14  ;;  %v1149_v14 = vld [vmem:[%s2760_s6 + $0x18] sm:$0xff] }
 0x4e0   :  { %v871_v12 = vmul.f32 %v2131_v58, %v2121_v11  ;;  %v1148_v11 = vld [vmem:[%s2760_s6 + $0x10] sm:$0xff] }
 0x4e1   :  { %v2071_v22 = vpack.c.bf16 %v1149_v14, %v1148_v11 }
 0x4e2   :  { %1870 = vmatprep.mubr.f32.mxu0 %v871_v12 }
 0x4e3   :  { %1871 = vmatmul.mubr.f32.gmra.mrb[26].mxu0 %v873_v20  ;;  %2072 = vmatprep.subr.bf16.mxu0 %v2071_v22 }
 0x4e4   :  { %2074 = vmatpush3.bf16.msra.mxu0 %v2071_v22 }
 0x5af   :  { %v1869_v18 = vpop.f32.mrb[24].mxu0 }
 0x5b0   :  { %v940_v53 = vpop.f32.mrb[25].mxu0 }
 0x5b1   :  { %1881 = vmatprep.mubr.msk.f32.mxu1 %vm72_vm0, %v940_v53 }
 0x5b2   :  { %1882 = vmatmul.mubr.msk.f32.vlgmr.msra.gmra.mrb[20].mxu1 %vm72_vm0, %v1869_v18 }
 0x5b3   :  { %2078 = vmatpush3.bf16.msra.mxu1 %v2075_v43 }
 0x5b4   :  { %2080 = vmatprep.subr.bf16.mxu1 %v2079_v47 }
 0x5b6   :  { %v1872_v60 = vpop.f32.mrb[26].mxu0 }
 0x5b7   :  { %v950_v54 = vpop.f32.mrb[27].mxu0  ;;  %2082 = vmatpush3.bf16.msra.mxu1 %v2079_v47 }
 0x5b8   :  { %1884 = vmatprep.mubr.msk.f32.mxu1 %vm72_vm0, %v950_v54  ;;  %2084 = vmatprep.subr.bf16.mxu1 %v2083_v50  ;;  %v1531_v54 = vld [vmem:[%s2764_s10] ss:$0 sm:$0xff] }
 0x5b9   :  { %1885 = vmatmul.mubr.msk.f32.gmra.mrb[22].mxu1 %vm72_vm0, %v1872_v60 }
 0x5bb   :  { %2086 = vmatpush3.bf16.msra.mxu1 %v2083_v50 }
 0x685   :  { %v1883_v59 = vpop.f32.mrb[20].mxu1 }
 0x686   :  { %v1054_v63 = vadd.f32 %v1883_v59, %v1526_v62  ;;  %v1048_v0 = vpop.f32.mrb[21].mxu1 }
 0x687   :  { %v1049_v61 = vadd.f32 %v1526_v62, %v1048_v0 }
 0x688   :  { %v1068_v1 = vadd.f32 %v1054_v63, %v2289_v7 }
 0x689   :  { %v1067_v3 = vadd.f32 %v1049_v61, %v2282_v5 }
 0x68a   :  { %v1076_v2 = vsel %vm72_vm0, %v1068_v1, 0.0 }
 0x68b   :  { %1077 = vadd.xlane.f32.xlu0 %v1076_v2  ;;  %v1073_v6 = vsel %vm72_vm0, %v1067_v3, 0.0 }
 0x68c   :  { %1074 = vadd.xlane.f32.xlu1 %v1073_v6  ;;  %v1886_v10 = vpop.f32.mrb[22].mxu1 }
 0x68d   :  { %v1064_v4 = vadd.f32 %v1886_v10, %v1526_v62  ;;  %v1058_v13 = vpop.f32.mrb[23].mxu1 }
 0x68e   :  { %v1059_v15 = vadd.f32 %v1526_v62, %v1058_v13 }
 0x68f   :  { %v1070_v17 = vadd.f32 %v1064_v4, %v2303_v9 }
 0x690   :  { %v1069_v19 = vadd.f32 %v1059_v15, %v2294_v8 }
 0x691   :  { %v1082_v16 = vsel %vm72_vm0, %v1070_v17, 0.0 }
 0x692   :  { %1083 = vadd.xlane.f32.xlu0 %v1082_v16  ;;  %v1079_v7 = vsel %vm72_vm0, %v1069_v19, 0.0 }
 0x693   :  { %1080 = vadd.xlane.f32.xlu1 %v1079_v7 }
 0x718   :  { %v1078_v5 = vpop.xlane.xlu0 %1077 }
 0x719   :  { %v1087_v21 = vmul.f32 0.03125, %v1078_v5  ;;  %v1075_v24 = vpop.xlane.xlu1 %1074 }
 0x71a   :  { %v1086_v23 = vmul.f32 0.03125, %v1075_v24  ;;  %v1265_v24 = vld [vmem:[%s2762_s8 + $0x38] sm:$0xff] }
 0x71b   :  { %v1091_v27 = vsub.f32 %v1068_v1, %v1087_v21  ;;  %v1264_v21 = vld [vmem:[%s2762_s8 + $0x30] sm:$0xff] }
 0x71c   :  { %v2663_v25 = vsub.f32 %v1067_v3, %v1086_v23  ;;  %v1532_v3 = vld [vmem:[%s2765_s11] ss:$0 sm:$0xff]  ;;  %v2087_v23 = vpack.c.bf16 %v1265_v24, %v1264_v21 }
 0x71d   :  { %v1095_v28 = vmul.f32 %v1091_v27, %v1091_v27  ;;  %v1121_v59 = vmul.f32 %v1531_v54, %v1091_v27  ;;  %v1533_v27 = vld [vmem:[%s2761_s7] ss:$0 sm:$0xff] }
 0x71e   :  { %v1094_v31 = vmul.f32 %v2663_v25, %v2663_v25  ;;  %v1120_v0 = vmul.f32 %v1531_v54, %v2663_v25  ;;  %2088 = vmatprep.subr.bf16.mxu1 %v2087_v23  ;;  %v1543_v21 = vld [vmem:[%s2766_s12] ss:$0 sm:$0xff]  ;;  %s2174_s12 = smov [#allocation2]  }
 0x71f   :  { %v1084_v9 = vpop.xlane.xlu0 %1083  ;;  %v1101_v8 = vsel %vm72_vm0, %v1095_v28, 0.0  ;;  %2090 = vmatpush3.bf16.msra.mxu1 %v2087_v23  ;;  %s1458_s22 = sshll.u32 %s2174_s12, 4  ;;  %s1459_s22 = int_to_ptr.vmem [resolvable:$true] %s1458_s22 }
 0x720   :  { %v1089_v29 = vmul.f32 0.03125, %v1084_v9  ;;  %1102 = vadd.xlane.f32.xlu0 %v1101_v8  ;;  %v1081_v30 = vpop.xlane.xlu1 %1080  ;;  %v1098_v32 = vsel %vm72_vm0, %v1094_v31, 0.0  ;;  %p2153_p1 = scmp.lt.s32.totalorder %s1459_s22, %s1459_s22 }
 0x721   :  { %v1088_v33 = vmul.f32 0.03125, %v1081_v30  ;;  %1099 = vadd.xlane.f32.xlu1 %v1098_v32 }
 0x722   :  { %v1093_v38 = vsub.f32 %v1070_v17, %v1089_v29 }
 0x723   :  { %v1092_v34 = vsub.f32 %v1069_v19, %v1088_v33 }
 0x724   :  { %v1097_v39 = vmul.f32 %v1093_v38, %v1093_v38  ;;  %v1123_v4 = vmul.f32 %v1531_v54, %v1093_v38 }
 0x725   :  { %v1096_v35 = vmul.f32 %v1092_v34, %v1092_v34  ;;  %v1122_v15 = vmul.f32 %v1531_v54, %v1092_v34 }
 0x726   :  { %v1107_v45 = vsel %vm72_vm0, %v1097_v39, 0.0 }
 0x727   :  { %1108 = vadd.xlane.f32.xlu0 %v1107_v45  ;;  %v1104_v36 = vsel %vm72_vm0, %v1096_v35, 0.0  ;;  %v1538_v35 = vld [vmem:[%s2763_s9] ss:$0 sm:$0xff] }
 0x728   :  { %1105 = vadd.xlane.f32.xlu1 %v1104_v36 }
 0x7ad   :  { %v1103_v51 = vpop.xlane.xlu0 %1102 }
 0x7ae   :  { %v1111_v52 = vmul.f32 0.03125, %v1103_v51  ;;  %v1100_v55 = vpop.xlane.xlu1 %1099 }
 0x7af   :  { %v1110_v56 = vmul.f32 0.03125, %v1100_v55 }
 0x7b0   :  { %v1125_v57 = vadd.f32 1e-06, %v1111_v52 }
 0x7b1   :  { %v1124_v58 = vadd.f32 1e-06, %v1110_v56 }
 0x7b2   :  { %2132 = vrsqrt.f32 %v1125_v57 }
 0x7b3   :  { %2134 = vrsqrt.f32 %v1124_v58 }
 0x7b4   :  { %v1109_v12 = vpop.xlane.xlu0 %1108 }
 0x7b5   :  { %v1113_v20 = vmul.f32 0.03125, %v1109_v12  ;;  %v1106_v18 = vpop.xlane.xlu1 %1105 }
 0x7b6   :  { %v1112_v53 = vmul.f32 0.03125, %v1106_v18 }
 0x7b7   :  { %v1127_v60 = vadd.f32 1e-06, %v1113_v20 }
 0x7b8   :  { %v1126_v62 = vadd.f32 1e-06, %v1112_v53 }
 0x7b9   :  { %2136 = vrsqrt.f32 %v1127_v60 }
 0x7ba   :  { %2138 = vrsqrt.f32 %v1126_v62 }
 0x7bc   :  { %v2133_v63 = vpop.eup %2132 }
 0x7bd   :  { %v2135_v61 = vpop.eup %2134  ;;  %v1133_v1 = vmul.f32 %v2133_v63, %v1121_v59 }
 0x7be   :  { %v1132_v2 = vmul.f32 %v2135_v61, %v1120_v0 }
 0x7bf   :  { %v1143_v10 = vadd.f32 %v1532_v3, %v1133_v1 }
 0x7c0   :  { %v1142_v6 = vadd.f32 %v1532_v3, %v1132_v2 }
 0x7c2   :  { %1895 = vmatprep.mubr.msk.f32.mxu0 %vm72_vm0, %v1142_v6 }
 0x7c3   :  { %v2137_v13 = vpop.eup %2136  ;;  %1896 = vmatmul.mubr.msk.f32.vlgmr.msra.gmra.mrb[28].mxu0 %vm72_vm0, %v1143_v10 }
 0x7c4   :  { %v2139_v17 = vpop.eup %2138  ;;  %v1135_v19 = vmul.f32 %v2137_v13, %v1123_v4 }
 0x7c5   :  { %v1134_v16 = vmul.f32 %v2139_v17, %v1122_v15 }
 0x7c6   :  { %v1145_v5 = vadd.f32 %v1532_v3, %v1135_v19 }
 0x7c7   :  { %v1144_v7 = vadd.f32 %v1532_v3, %v1134_v16 }
 0x7c9   :  { %1898 = vmatprep.mubr.msk.f32.mxu0 %vm72_vm0, %v1144_v7 }
 0x7ca   :  { %1899 = vmatmul.mubr.msk.f32.gmra.mrb[30].mxu0 %vm72_vm0, %v1145_v5 }
 0x896   :  { %v1897_v25 = vpop.f32.mrb[28].mxu0 }
 0x897   :  { %v1241_v28 = vadd.f32 %v1897_v25, %v1533_v27  ;;  %v1235_v31 = vpop.f32.mrb[29].mxu0 }
 0x898   :  { %v1236_v9 = vadd.f32 %v1533_v27, %v1235_v31 }
 0x899   :  { %v1255_v29 = vmax.f32 %v1241_v28, 0.0  ;;  %v1544_v28 = vld [vmem:[%s2767_s13] ss:$0 sm:$0xff]  ;;  %s2148_s13 = scalar_lea.vmem %s1459_s22, 512 }
 0x89a   :  { %v1254_v8 = vmax.f32 %v1236_v9, 0.0  ;;  %p2149_p0 = scmp.ne.s32.totalorder %s1459_s22, %s2148_s13  ;;  %p2154_p2 = scmp.lt.s32.totalorder %s2148_s13, %s2148_s13 }
 0x89c   :  { %1917 = vmatprep.mubr.msk.f32.mxu1 %vm1273_vm2, %v1254_v8  ;;  %p2155_p3 = por %p2154_p2, %p2153_p1 }
 0x89d   :  { %v1900_v30 = vpop.f32.mrb[30].mxu0  ;;  %1918 = vmatmul.mubr.msk.f32.vlgmr.msra.gmra.mrb[24].mxu1 %vm1273_vm2, %v1255_v29 }
 0x89e   :  { %v1251_v32 = vadd.f32 %v1900_v30, %v1533_v27  ;;  %v1245_v33 = vpop.f32.mrb[31].mxu0  ;;  %p2156_p4 = pnand %p2155_p3, %p2149_p0 }
 0x89f   :  { %v1246_v38 = vadd.f32 %v1533_v27, %v1245_v33 }
 0x8a0   :  { %v1257_v39 = vmax.f32 %v1251_v32, 0.0 }
 0x8a1   :  { %v1256_v34 = vmax.f32 %v1246_v38, 0.0 }
 0x8a3   :  { %1920 = vmatprep.mubr.msk.f32.mxu1 %vm1273_vm2, %v1256_v34 }
 0x8a4   :  { %1921 = vmatmul.mubr.msk.f32.gmra.mrb[26].mxu1 %vm1273_vm2, %v1257_v39 }
 0x970   :  { %v1919_v45 = vpop.f32.mrb[24].mxu1 }
 0x971   :  { %v1358_v36 = vadd.f32 %v1919_v45, %v1538_v35  ;;  %v1352_v46 = vpop.f32.mrb[25].mxu1 }
 0x972   :  { %v1353_v37 = vadd.f32 %v1538_v35, %v1352_v46 }
 0x973   :  { %v1372_v40 = vadd.f32 %v1358_v36, %v1143_v10 }
 0x974   :  { %v1371_v11 = vadd.f32 %v1353_v37, %v1142_v6 }
 0x975   :  { %v1380_v14 = vsel %vm72_vm0, %v1372_v40, 0.0 }
 0x976   :  { %1381 = vadd.xlane.f32.xlu0 %v1380_v14  ;;  %v1377_v22 = vsel %vm72_vm0, %v1371_v11, 0.0 }
 0x977   :  { %1378 = vadd.xlane.f32.xlu1 %v1377_v22  ;;  %v1922_v26 = vpop.f32.mrb[26].mxu1 }
 0x978   :  { %v1368_v41 = vadd.f32 %v1922_v26, %v1538_v35  ;;  %v1362_v42 = vpop.f32.mrb[27].mxu1 }
 0x979   :  { %v1363_v43 = vadd.f32 %v1538_v35, %v1362_v42 }
 0x97a   :  { %v1374_v44 = vadd.f32 %v1368_v41, %v1145_v5 }
 0x97b   :  { %v1373_v47 = vadd.f32 %v1363_v43, %v1144_v7 }
 0x97c   :  { %v1386_v48 = vsel %vm72_vm0, %v1374_v44, 0.0 }
 0x97d   :  { %1387 = vadd.xlane.f32.xlu0 %v1386_v48  ;;  %v1383_v49 = vsel %vm72_vm0, %v1373_v47, 0.0 }
 0x97e   :  { %1384 = vadd.xlane.f32.xlu1 %v1383_v49 }
 0xa03   :  { %v1382_v50 = vpop.xlane.xlu0 %1381 }
 0xa04   :  { %v1390_v51 = vmul.f32 0.03125, %v1382_v50  ;;  %v1379_v52 = vpop.xlane.xlu1 %1378 }
 0xa05   :  { %v1389_v55 = vmul.f32 0.03125, %v1379_v52 }
 0xa06   :  { %v1394_v56 = vsub.f32 %v1372_v40, %v1390_v51 }
 0xa07   :  { %v1393_v57 = vsub.f32 %v1371_v11, %v1389_v55 }
 0xa08   :  { %v1398_v58 = vmul.f32 %v1394_v56, %v1394_v56  ;;  %v1424_v23 = vmul.f32 %v1543_v21, %v1394_v56 }
 0xa09   :  { %v1397_v12 = vmul.f32 %v1393_v57, %v1393_v57  ;;  %v1423_v25 = vmul.f32 %v1543_v21, %v1393_v57 }
 0xa0a   :  { %v1388_v20 = vpop.xlane.xlu0 %1387  ;;  %v1404_v18 = vsel %vm72_vm0, %v1398_v58, 0.0 }
 0xa0b   :  { %v1392_v53 = vmul.f32 0.03125, %v1388_v20  ;;  %1405 = vadd.xlane.f32.xlu0 %v1404_v18  ;;  %v1385_v60 = vpop.xlane.xlu1 %1384  ;;  %v1401_v54 = vsel %vm72_vm0, %v1397_v12, 0.0 }
 0xa0c   :  { %v1391_v62 = vmul.f32 0.03125, %v1385_v60  ;;  %1402 = vadd.xlane.f32.xlu1 %v1401_v54 }
 0xa0d   :  { %v1396_v59 = vsub.f32 %v1374_v44, %v1392_v53 }
 0xa0e   :  { %v1395_v63 = vsub.f32 %v1373_v47, %v1391_v62 }
 0xa0f   :  { %v1400_v0 = vmul.f32 %v1396_v59, %v1396_v59  ;;  %v1426_v32 = vmul.f32 %v1543_v21, %v1396_v59 }
 0xa10   :  { %v1399_v61 = vmul.f32 %v1395_v63, %v1395_v63  ;;  %v1425_v38 = vmul.f32 %v1543_v21, %v1395_v63 }
 0xa11   :  { %v1410_v1 = vsel %vm72_vm0, %v1400_v0, 0.0 }
 0xa12   :  { %1411 = vadd.xlane.f32.xlu0 %v1410_v1  ;;  %v1407_v3 = vsel %vm72_vm0, %v1399_v61, 0.0 }
 0xa13   :  { %1408 = vadd.xlane.f32.xlu1 %v1407_v3 }
 0xa98   :  { %v1406_v2 = vpop.xlane.xlu0 %1405 }
 0xa99   :  { %v1414_v6 = vmul.f32 0.03125, %v1406_v2  ;;  %v1403_v10 = vpop.xlane.xlu1 %1402 }
 0xa9a   :  { %v1413_v4 = vmul.f32 0.03125, %v1403_v10 }
 0xa9b   :  { %v1428_v13 = vadd.f32 1e-06, %v1414_v6 }
 0xa9c   :  { %v1427_v15 = vadd.f32 1e-06, %v1413_v4 }
 0xa9d   :  { %2140 = vrsqrt.f32 %v1428_v13 }
 0xa9e   :  { %2142 = vrsqrt.f32 %v1427_v15 }
 0xa9f   :  { %v1412_v17 = vpop.xlane.xlu0 %1411 }
 0xaa0   :  { %v1416_v19 = vmul.f32 0.03125, %v1412_v17  ;;  %v1409_v16 = vpop.xlane.xlu1 %1408 }
 0xaa1   :  { %v1415_v7 = vmul.f32 0.03125, %v1409_v16 }
 0xaa2   :  { %v1430_v5 = vadd.f32 1e-06, %v1416_v19 }
 0xaa3   :  { %v1429_v24 = vadd.f32 1e-06, %v1415_v7 }
 0xaa4   :  { %2144 = vrsqrt.f32 %v1430_v5 }
 0xaa5   :  { %2146 = vrsqrt.f32 %v1429_v24 }
 0xaa7   :  { %v2141_v27 = vpop.eup %2140 }
 0xaa8   :  { %v2143_v31 = vpop.eup %2142  ;;  %v1436_v9 = vmul.f32 %v2141_v27, %v1424_v23 }
 0xaa9   :  { %v1435_v8 = vmul.f32 %v2143_v31, %v1423_v25 }
 0xaaa   :  { %v1446_v29 = vadd.f32 %v1544_v28, %v1436_v9 }
 0xaab   :  { %v1445_v30 = vadd.f32 %v1544_v28, %v1435_v8 }
 0xaac   :  { %1450 = vst.msk [vmem:[#allocation2 + $0x8] sm:$0xff] %vm72_vm0, %v1446_v29 }
 0xaad   :  { %1449 = vst.msk [vmem:[#allocation2] sm:$0xff] %vm72_vm0, %v1445_v30 }
 0xaae   :  { %v2145_v33 = vpop.eup %2144 }
 0xaaf   :  { %v2147_v34 = vpop.eup %2146  ;;  %v1438_v39 = vmul.f32 %v2145_v33, %v1426_v32 }
 0xab0   :  { %v1437_v35 = vmul.f32 %v2147_v34, %v1425_v38 }
 0xab1   :  { %v1448_v45 = vadd.f32 %v1544_v28, %v1438_v39 }
 0xab2   :  { %v1447_v36 = vadd.f32 %v1544_v28, %v1437_v35 }
 0xab3   :  { %1452 = vst.msk [vmem:[#allocation2 + $0x18] sm:$0xff] %vm72_vm0, %v1448_v45 }
 0xab4   :  { %1451 = vst.msk [vmem:[#allocation2 + $0x10] sm:$0xff] %vm72_vm0, %v1447_v36 }
 0xab5   :  { %2159 = shalt.err (!%p2156_p4)
}
 0xab6   :  { %s2160_s24 = scalar_lea.hbm %s2771_s17, 512 }
 0xab7   :  { %p2161_p5 = scmp.ne.s32.totalorder %s2771_s17, %s2160_s24  ;;  %p2164_p6 = scmp.lt.u32.totalorder %s2160_s24, %s2771_s17 }
 0xab9   :  { %p2166_p7 = pnand %p2164_p6, %p2161_p5 }
 0xabb   :  { %2169 = shalt.err (!%p2166_p7)
}
 0xabc   :  { %s2175_s6 = smov 128   ;;  %s2176_s28 = smov 8  }
 0xabd   :  { %1464 = dma.vmem_to_hbm [thread:$0]  %s1459_s22, 512, %s2771_s17, [#allocation3], %s2175_s6, %s2175_s6, %s2176_s28  }
 0xabe   :  { %2170 = dma.done.wait [#allocation3], 512  }
 0xabf   :  { %2171 = vsyncadd [#allocation3], 4294966784 }
 0xac0   :  { %1468 = vsyncpa [#allocation3], 1 }

</bundles_post_ra>
